<compile_context>
chip_gen: v7x
topology: tpu7x:2x2x1
jax: 0.10.0
libtpu: 0.0.40
codegen_flags: <defaults>
</compile_context>

<pallas_src>
import functools
import zlib

import jax
import jax.numpy as jnp
from jax.experimental import pallas as pl
from jax.experimental.pallas import tpu as pltpu

_LANES = 128
# 2048 rows * 128 lanes * 4 B = 1 MiB per f32 buffer; in+out double-buffered
# is ~4 MiB, comfortably inside every generation's scoped-VMEM default.
_MAX_BLOCK_ROWS = 2048


def _hash_u32(x):
    """lowbias32 integer finalizer: good avalanche for counter-based RNG."""
    x = x ^ (x >> 16)
    x = x * jnp.uint32(0x7FEB352D)
    x = x ^ (x >> 15)
    x = x * jnp.uint32(0x846CA68B)
    x = x ^ (x >> 16)
    return x


def _dropout_kernel(x_ref, o_ref, *, seed, threshold31, scale, block_rows):
    rows, lanes = x_ref.shape
    # Global linear element index of each lane in this block.
    # (int32 wraps for tensors > 2^31 elements; acceptable for dropout.)
    base = pl.program_id(0) * (block_rows * lanes)
    row = jax.lax.broadcasted_iota(jnp.int32, (rows, lanes), 0)
    col = jax.lax.broadcasted_iota(jnp.int32, (rows, lanes), 1)
    idx = row * lanes + col + base
    # Stateless per-element random bits: hash(global_index ^ per-key seed).
    bits = _hash_u32(idx.astype(jnp.uint32) ^ jnp.uint32(seed))
    # Top 31 bits as a non-negative int32; keep with probability (1 - p).
    bits31 = (bits >> 1).astype(jnp.int32)
    keep = bits31 >= threshold31
    x = x_ref[...]
    o_ref[...] = jnp.where(keep, x * scale, jnp.zeros_like(x)).astype(o_ref.dtype)


def pallas_dropout(x: jax.Array, seed: int, p: float, deterministic: bool = False) -> jax.Array:
    """Inverted dropout on one array, matching torch.nn.Dropout(p) in train mode."""
    p = float(p)
    if deterministic or p <= 0.0:
        return x
    if p >= 1.0:
        return jnp.zeros_like(x)

    orig_shape = x.shape
    orig_dtype = x.dtype
    n = x.size
    if n == 0:
        return x

    flat = x.reshape(-1)
    pad = (-n) % _LANES
    if pad:
        # Only pad to the next multiple of 128 lanes, and only when the element
        # count is not already lane aligned (no full-slab concatenate copy).
        flat = jnp.pad(flat, (0, pad))
    rows = flat.shape[0] // _LANES
    x2d = flat.reshape(rows, _LANES)

    # Biggest lane-dense block that fits VMEM: full array if small, otherwise
    # 2048-row tiles with a ragged last block handled by Pallas.
    tr = rows if rows <= _MAX_BLOCK_ROWS else _MAX_BLOCK_ROWS
    grid = (pl.cdiv(rows, tr),)

    kernel = functools.partial(
        _dropout_kernel,
        seed=int(seed) & 0xFFFFFFFF,
        threshold31=min(int(round(p * float(1 << 31))), (1 << 31) - 1),
        scale=1.0 / (1.0 - p),
        block_rows=tr,
    )

    out2d = pl.pallas_call(
        kernel,
        out_shape=jax.ShapeDtypeStruct((rows, _LANES), orig_dtype),
        grid=grid,
        in_specs=[pl.BlockSpec((tr, _LANES), lambda i: (i, 0))],
        out_specs=pl.BlockSpec((tr, _LANES), lambda i: (i, 0)),
        compiler_params=pltpu.CompilerParams(
            # Stateless hash RNG -> every block independent -> shard across
            # both TensorCores on v7x; neutral on v5e/v6e.
            dimension_semantics=("parallel",),
        ),
    )(x2d)

    out = out2d.reshape(-1)
    if pad:
        out = out[:n]
    return out.reshape(orig_shape)


class DropoutModuleDictPallas:
    """JAX/Pallas port of DropoutModuleDict: one Dropout(p) per dict key."""

    def __init__(self, irreps_in_dict, p: float, base_seed: int = 0):
        self.irreps_in_dict = dict(irreps_in_dict)
        self.probability = float(p)
        # Per-key seed = hash(key name) mixed with the base seed so the random
        # streams of different dict entries never collide.
        mix = (int(base_seed) * 0x9E3779B1) & 0xFFFFFFFF
        self._seeds = {
            k: (zlib.crc32(str(k).encode("utf-8")) ^ mix) & 0xFFFFFFFF
            for k in self.irreps_in_dict
        }
        # TODO(synk): no bit-exact match to torch's global RNG stream is possible;
        # the distribution (Bernoulli keep-prob 1-p, inverted scaling) is identical.

    def __call__(self, x_dict, deterministic: bool = False):
        return {
            k: pallas_dropout(v, self._seeds[k], self.probability, deterministic)
            for k, v in x_dict.items()
        }


if __name__ == "__main__":
    key = jax.random.PRNGKey(0)
    k1, k2 = jax.random.split(key)

    # Small synthetic inputs (the module is shape-agnostic; irreps values unused).
    x_dict = {
        "node": jax.random.normal(k1, (2, 4, 16, 16), dtype=jnp.float32),  # NCHW-like
        "edge": jax.random.normal(k2, (8, 32), dtype=jnp.float32),
    }
    irreps_in_dict = {"node": None, "edge": None}  # only keys matter
    p = 0.25

    module = DropoutModuleDictPallas(irreps_in_dict, p)
    out_dict = module(x_dict)
    out_dict = jax.block_until_ready(out_dict)

    scale = 1.0 / (1.0 - p)
    for k in x_dict:
        x, o = x_dict[k], out_dict[k]
        assert o.shape == x.shape and o.dtype == x.dtype
        kept = o != 0
        # Surviving elements are exactly x / (1 - p); dropped elements are 0.
        assert bool(jnp.all(jnp.where(kept, jnp.abs(o - x * scale) < 1e-5, True)))

    # Drop fraction on the larger tensor should be roughly p (very loose bounds).
    frac_dropped = float(jnp.mean((out_dict["node"] == 0).astype(jnp.float32)))
    assert 0.10 < frac_dropped < 0.45, frac_dropped

    # Eval mode is the identity.
    out_eval = module(x_dict, deterministic=True)
    for k in x_dict:
        assert bool(jnp.all(out_eval[k] == x_dict[k]))

    print("KERNEL_OK")
</pallas_src>

<mosaic_0001>
module attributes {stable_mosaic.version = 11 : i64} {
  func.func @_dropout_kernel(%arg0: i32, %arg1: memref<16x128xf32, #tpu.memory_space<vmem>>, %arg2: memref<16x128xf32, #tpu.memory_space<vmem>>) attributes {dimension_semantics = [#tpu.dimension_semantics<parallel>], iteration_bounds = array<i64: 1>, scalar_prefetch = 0 : i64, scratch_operands = 0 : i64, tpu.core_type = #tpu.core_type<tc>, window_params = [{transform_indices = @transform_0, window_bounds = array<i64: 16, 128>}, {transform_indices = @transform_1, window_bounds = array<i64: 16, 128>}]} {
    %c2048_i32 = arith.constant 2048 : i32
    %0 = arith.muli %arg0, %c2048_i32 : i32
    %1 = tpu.iota {dimensions = array<i32: 0>} : vector<16x128xi32>
    %2 = tpu.iota {dimensions = array<i32: 1>} : vector<16x128xi32>
    %c128_i32 = arith.constant 128 : i32
    %3 = vector.broadcast %c128_i32 : i32 to vector<16x128xi32>
    %4 = arith.muli %1, %3 : vector<16x128xi32>
    %5 = arith.addi %4, %2 : vector<16x128xi32>
    %6 = vector.broadcast %0 : i32 to vector<16x128xi32>
    %7 = arith.addi %5, %6 : vector<16x128xi32>
    %c-2055215035_i32 = arith.constant -2055215035 : i32
    %8 = vector.broadcast %c-2055215035_i32 : i32 to vector<16x128xi32>
    %9 = arith.xori %7, %8 : vector<16x128xi32>
    %c16_i32 = arith.constant 16 : i32
    %10 = vector.broadcast %c16_i32 : i32 to vector<16x128xi32>
    %11 = arith.shrui %9, %10 : vector<16x128xi32>
    %12 = arith.xori %9, %11 : vector<16x128xi32>
    %c2146121005_i32 = arith.constant 2146121005 : i32
    %13 = vector.broadcast %c2146121005_i32 : i32 to vector<16x128xi32>
    %14 = arith.muli %12, %13 : vector<16x128xi32>
    %c15_i32 = arith.constant 15 : i32
    %15 = vector.broadcast %c15_i32 : i32 to vector<16x128xi32>
    %16 = arith.shrui %14, %15 : vector<16x128xi32>
    %17 = arith.xori %14, %16 : vector<16x128xi32>
    %c-2073254261_i32 = arith.constant -2073254261 : i32
    %18 = vector.broadcast %c-2073254261_i32 : i32 to vector<16x128xi32>
    %19 = arith.muli %17, %18 : vector<16x128xi32>
    %c16_i32_0 = arith.constant 16 : i32
    %20 = vector.broadcast %c16_i32_0 : i32 to vector<16x128xi32>
    %21 = arith.shrui %19, %20 : vector<16x128xi32>
    %22 = arith.xori %19, %21 : vector<16x128xi32>
    %c1_i32 = arith.constant 1 : i32
    %23 = vector.broadcast %c1_i32 : i32 to vector<16x128xi32>
    %24 = arith.shrui %22, %23 : vector<16x128xi32>
    %c536870912_i32 = arith.constant 536870912 : i32
    %25 = vector.broadcast %c536870912_i32 : i32 to vector<16x128xi32>
    %26 = arith.cmpi sge, %24, %25 : vector<16x128xi32>
    %c0 = arith.constant 0 : index
    %c0_1 = arith.constant 0 : index
    %27 = vector.load %arg1[%c0, %c0_1] : memref<16x128xf32, #tpu.memory_space<vmem>>, vector<16x128xf32>
    %cst = arith.constant 1.33333337 : f32
    %28 = vector.broadcast %cst : f32 to vector<16x128xf32>
    %29 = arith.mulf %27, %28 : vector<16x128xf32>
    %cst_2 = arith.constant 0.000000e+00 : f32
    %30 = vector.broadcast %cst_2 : f32 to vector<16x128xf32>
    %31 = arith.select %26, %29, %30 : vector<16x128xi1>, vector<16x128xf32>
    %c0_3 = arith.constant 0 : index
    %c0_4 = arith.constant 0 : index
    %32 = vector.load %arg2[%c0_3, %c0_4] : memref<16x128xf32, #tpu.memory_space<vmem>>, vector<16x128xf32>
    tpu.vector_store %arg2[%c0_3, %c0_4], %31 {strides = array<i32>} : memref<16x128xf32, #tpu.memory_space<vmem>>, vector<16x128xf32>,
    return
  }
  func.func @transform_0(%arg0: i32) -> (i32, i32) {
    %c0_i32 = arith.constant 0 : i32
    %c0_i32_0 = arith.constant 0 : i32
    return %arg0, %c0_i32 : i32, i32
  }
  func.func @transform_1(%arg0: i32) -> (i32, i32) {
    %c0_i32 = arith.constant 0 : i32
    %c0_i32_0 = arith.constant 0 : i32
    return %arg0, %c0_i32 : i32, i32
  }
}

</mosaic_0001>

<bundles_post_ra>
// kernel: tpu_custom_call.1
= control target key start
LH: loop header
LB: loop body
LE: loop exit
PB: predicated region body
PF: predicated region fallthrough
CT: control target
= control target key end

     0   :  { %6 = vsyncpa [#allocation3], 0  ;;  %s179_s0 = inlined_call_operand.hbm [shape: f32[16,128], index: 0, kind: input, shape index: {}]   ;;  %s180_s1 = inlined_call_operand.hbm [shape: f32[16,128], index: 1, kind: output, shape index: {}]  }
   0x1   :  { %7 = vsyncpa [#allocation4], 0  ;;  %s135_s6 = smov [#allocation2]   ;;  %s87_s10 = scalar_lea.hbm %s179_s0, 256 }
   0x2   :  { %s13_s7 = sshll.u32 %s135_s6, 4  ;;  %p88_p0 = scmp.ne.s32.totalorder %s179_s0, %s87_s10  ;;  %s14_s7 = int_to_ptr.vmem [resolvable:$true] %s13_s7 }
   0x3   :  { %p91_p1 = scmp.lt.u32.totalorder %s87_s10, %s179_s0 }
   0x5   :  { %p93_p2 = pnand %p91_p1, %p88_p0 }
   0x7   :  { %96 = shalt.err (!%p93_p2)
}
   0x8   :  { %s97_s15 = scalar_lea.vmem %s14_s7, 256  ;;  %p102_p4 = scmp.lt.s32.totalorder %s14_s7, %s14_s7 }
   0x9   :  { %p98_p3 = scmp.ne.s32.totalorder %s14_s7, %s97_s15  ;;  %p103_p5 = scmp.lt.s32.totalorder %s97_s15, %s97_s15 }
   0xb   :  { %p104_p6 = por %p103_p5, %p102_p4 }
   0xd   :  { %p105_p7 = pnand %p104_p6, %p98_p3 }
   0xf   :  { %108 = shalt.err (!%p105_p7)
}
  0x10   :  { %s136_s16 = smov 128   ;;  %s137_s17 = smov 8  }
  0x11   :  { %19 = dma.hbm_to_vmem [thread:$0]  %s179_s0, 256, %s14_s7, [#allocation3], %s136_s16, %s136_s16, %s137_s17  }
  0x12   :  { %131 = dma.done.wait [#allocation3], 256  }
  0x13   :  { %132 = vsyncadd [#allocation3], 4294967040  ;;  %v24_v0 = vlaneseq  ;;  %v58_v22 = vld [vmem:[#allocation2] sm:$0xff]  ;;  %v59_v26 = vld [vmem:[#allocation2 + $0x8] sm:$0xff]  ;;  %s138_s0 = smov [#allocation5]  }
  0x14   :  { %v60_v27 = vmul.f32 1.3333334, %v58_v22  ;;  %v61_v30 = vmul.f32 1.3333334, %v59_v26  ;;  %s71_s20 = sshll.u32 %s138_s0, 4  ;;  %s72_s20 = int_to_ptr.vmem [resolvable:$true] %s71_s20 }
  0x15   :  { %v25_v1 = vshrl.u32 %v24_v0, 7  ;;  %v28_v2 = vand.u32 127, %v24_v0  ;;  %s109_s21 = scalar_lea.vmem %s72_s20, 256  ;;  %p114_p9 = scmp.lt.s32.totalorder %s72_s20, %s72_s20 }
  0x16   :  { %p110_p8 = scmp.ne.s32.totalorder %s72_s20, %s109_s21  ;;  %p115_p10 = scmp.lt.s32.totalorder %s109_s21, %s109_s21 }
  0x17   :  { %v29_v3 = vmul.u32 128, %v25_v1  ;;  %v26_v4 = vadd.s32 8, %v25_v1 }
  0x18   :  { %p116_p11 = por %p115_p10, %p114_p9 }
  0x19   :  { %v31_v5 = vadd.s32 %v29_v3, %v28_v2  ;;  %v30_v6 = vmul.u32 128, %v26_v4 }
  0x1a   :  { %p117_p12 = pnand %p116_p11, %p110_p8 }
  0x1b   :  { %v36_v7 = vxor.u32 2239752261, %v31_v5  ;;  %v32_v8 = vadd.s32 %v30_v6, %v28_v2 }
  0x1d   :  { %v38_v9 = vshrl.u32 %v36_v7, 16  ;;  %v37_v10 = vxor.u32 2239752261, %v32_v8 }
  0x1f   :  { %v40_v11 = vxor.u32 %v38_v9, %v36_v7  ;;  %v39_v12 = vshrl.u32 %v37_v10, 16 }
  0x21   :  { %v42_v13 = vmul.u32 2146121005, %v40_v11  ;;  %v41_v14 = vxor.u32 %v39_v12, %v37_v10 }
  0x23   :  { %v44_v15 = vshrl.u32 %v42_v13, 15  ;;  %v43_v16 = vmul.u32 2146121005, %v41_v14 }
  0x25   :  { %v46_v17 = vxor.u32 %v44_v15, %v42_v13  ;;  %v45_v18 = vshrl.u32 %v43_v16, 15 }
  0x27   :  { %v48_v19 = vmul.u32 2221713035, %v46_v17  ;;  %v47_v20 = vxor.u32 %v45_v18, %v43_v16 }
  0x29   :  { %v50_v21 = vshrl.u32 %v48_v19, 16  ;;  %v49_v23 = vmul.u32 2221713035, %v47_v20 }
  0x2b   :  { %v52_v24 = vxor.u32 %v50_v21, %v48_v19  ;;  %v51_v25 = vshrl.u32 %v49_v23, 16 }
  0x2d   :  { %v54_v28 = vshrl.u32 %v52_v24, 1  ;;  %v53_v29 = vxor.u32 %v51_v25, %v49_v23 }
  0x2f   :  { %vm56_vm0 = vcmp.ge.s32.totalorder %v54_v28, 536870912  ;;  %v55_v31 = vshrl.u32 %v53_v29, 1 }
  0x30   :  { %v62_v32 = vsel %vm56_vm0, %v60_v27, 0.0 }
  0x31   :  { %64 = vst [vmem:[#allocation5] sm:$0xff] %v62_v32  ;;  %vm57_vm1 = vcmp.ge.s32.totalorder %v55_v31, 536870912 }
  0x32   :  { %v63_v33 = vsel %vm57_vm1, %v61_v30, 0.0 }
  0x33   :  { %65 = vst [vmem:[#allocation5 + $0x8] sm:$0xff] %v63_v33 }
  0x34   :  { %120 = shalt.err (!%p117_p12)
}
  0x35   :  { %s121_s24 = scalar_lea.hbm %s180_s1, 256 }
  0x36   :  { %p122_p13 = scmp.ne.s32.totalorder %s180_s1, %s121_s24  ;;  %p125_p0 = scmp.lt.u32.totalorder %s121_s24, %s180_s1 }
  0x38   :  { %p127_p1 = pnand %p125_p0, %p122_p13 }
  0x3a   :  { %130 = shalt.err (!%p127_p1)
}
  0x3b   :  { %77 = dma.vmem_to_hbm [thread:$0]  %s72_s20, 256, %s180_s1, [#allocation4], %s136_s16, %s136_s16, %s137_s17  }
  0x3c   :  { %133 = dma.done.wait [#allocation4], 256  }
  0x3d   :  { %134 = vsyncadd [#allocation4], 4294967040 }
  0x3e   :  { %81 = vsyncpa [#allocation3], 1 }
  0x3f   :  { %82 = vsyncpa [#allocation4], 1 }

</bundles_post_ra>
